<compile_context>
chip_gen: v5e
topology: v5e:2x2
jax: 0.10.0
libtpu: 0.0.40
codegen_flags: <defaults>
</compile_context>

<pallas_src>
import functools

import jax
import jax.numpy as jnp
from jax import lax
from jax.experimental import pallas as pl
from jax.experimental.pallas import tpu as pltpu


def _cacopn_kernel(q_ref, w_ref, mb_ref, logit_ref):
    w = w_ref[...]                                          # (C, TK) f32 raw bank tile
    q = q_ref[...]                                          # (N, C)  f32 queries (resident)

    # Per-column squared L2 norm (sublane reduction) + EUP rsqrt.
    # Clamping sq_sum at eps^2 = 1e-24 reproduces F.normalize's
    # w / max(||w||, 1e-12) semantics.
    sq_sum = jnp.sum(w * w, axis=0, keepdims=True)          # (1, TK)
    inv_norm = lax.rsqrt(jnp.maximum(sq_sum, 1e-24))        # (1, TK)

    # MXU matmul on the raw tile, then a cheap per-column post-scale.
    # Algebraically identical to q @ normalize(w).
    raw_logit = jnp.dot(
        q, w,
        preferred_element_type=jnp.float32,
        precision=lax.Precision.HIGHEST,
    )                                                       # (N, TK)
    logit_ref[...] = raw_logit * inv_norm

    # Normalized memory bank (VPU broadcast multiply).  When K is not a
    # multiple of tk, the padded columns of the last tile contain garbage; the
    # rsqrt/matmul on them is computed but masked on writeback, so outputs are
    # correct -- do NOT add a guard here (it would serialize the tile).
    mb_ref[...] = (w * inv_norm).astype(mb_ref.dtype)


def _round_up(x, m):
    return ((x + m - 1) // m) * m


def _vmem_capacity_bytes():
    """Physical VMEM of the local TPU; conservative (v7x-sized) fallback."""
    try:
        return int(pltpu.get_tpu_info().vmem_capacity_bytes)
    except Exception:
        return 64 << 20


def _tile_footprint_bytes(C, N, tk):
    # Double-buffered W-in + mb-out + logit-out tiles, plus q resident ONCE
    # (q's index map is constant, so it is fetched once and revisited).
    return 4 * (2 * C * tk + 2 * C * tk + 2 * N * tk + N * C)


def _pick_tile_k(K, C, N, vmem_bytes):
    """Largest lane-dense K tile that fits a generation-aware VMEM budget."""
    k_pad = _round_up(K, 128)
    big_vmem = vmem_bytes >= (128 << 20)                 # v5e / v6e: 128 MiB physical
    budget = (64 << 20) if big_vmem else (24 << 20)      # v7x: 64 MiB physical
    tk = 4096 if big_vmem else 2048
    while tk > 128 and _tile_footprint_bytes(C, N, tk) > budget:
        tk //= 2
    tk = min(tk, k_pad)
    if not big_vmem and k_pad >= 256:
        # v7x has 2 TensorCores and dimension_semantics=("parallel",) shards K
        # tiles across them: make sure there are at least 2 tiles so neither
        # core idles.
        tk = min(tk, _round_up(k_pad // 2, 128))
    return tk


@functools.partial(jax.jit, static_argnames=("tk", "vmem_limit", "mb_bf16"))
def _cacopn_pallas(q, W, tk, vmem_limit, mb_bf16):
    N, C = q.shape
    _, K = W.shape
    grid_k = pl.cdiv(K, tk)

    cost = pl.CostEstimate(
        flops=2 * N * C * K,
        transcendentals=K,                                # one rsqrt per column
        bytes_accessed=4 * (2 * C * K + N * C + N * K),
    )

    mb_dtype = jnp.bfloat16 if mb_bf16 else jnp.float32
    mb_shape = jax.ShapeDtypeStruct((C, K), mb_dtype)
    logit_shape = jax.ShapeDtypeStruct((N, K), jnp.float32)

    return pl.pallas_call(
        _cacopn_kernel,
        out_shape=(mb_shape, logit_shape),
        grid_spec=pltpu.PrefetchScalarGridSpec(
            num_scalar_prefetch=0,
            grid=(grid_k,),
            in_specs=[
                pl.BlockSpec((N, C), lambda k: (0, 0)),    # q: resident across K tiles
                pl.BlockSpec((C, tk), lambda k: (0, k)),   # W: streamed K tiles
            ],
            out_specs=[
                pl.BlockSpec((C, tk), lambda k: (0, k)),   # memory_bank tile
                pl.BlockSpec((N, tk), lambda k: (0, k)),   # logit tile
            ],
        ),
        compiler_params=pltpu.CompilerParams(
            dimension_semantics=("parallel",),             # K tiles independent
            vmem_limit_bytes=vmem_limit,
        ),
        cost_estimate=cost,
    )(q, W)


def cacopn_forward(q, W, *, tile_k=None, mb_bf16=False):
    """Pallas implementation of CaCoPN.forward.

    Args:
      q: (N, C) float32 queries.
      W: (C, K) float32 memory bank buffer.
      tile_k: optional override for the K tile width (multiple of 128).
      mb_bf16: if True, emit memory_bank in bfloat16 (halves the writeback
        bytes of the dominant output; semantics change, default off).

    Returns:
      (memory_bank, W, logit) matching the PyTorch module.
    """
    N, C = q.shape
    C2, K = W.shape
    assert C == C2, "q feature dim must match W rows"

    vmem_bytes = _vmem_capacity_bytes()

    # Lane-dense outputs for tiny banks: pad K up to 128 and slice back.
    K_run, W_run = K, W
    if K < 128:
        K_run = 128
        W_run = jnp.pad(W, ((0, 0), (0, K_run - K)))

    tk = tile_k if tile_k is not None else _pick_tile_k(K_run, C, N, vmem_bytes)
    foot = _tile_footprint_bytes(C, N, tk)
    if vmem_bytes >= (128 << 20):
        # v5e / v6e: 128 MiB physical VMEM -> allow big tiles.
        vmem_limit = int(min(max(foot + (8 << 20), 64 << 20), 96 << 20))
    else:
        # v7x: 64 MiB physical VMEM -> keep headroom for Mosaic scratch.
        vmem_limit = int(min(max(foot + (4 << 20), 32 << 20), 48 << 20))

    mb, logit = _cacopn_pallas(q, W_run, tk, vmem_limit, bool(mb_bf16))
    if K_run != K:
        mb = mb[:, :K]
        logit = logit[:, :K]

    # W is returned unchanged (registered buffer pass-through).
    # TODO(synk): CaCoPN.update() (momentum buffer `v`) is training-side state
    # mutation with no forward-pass role; not implemented here.
    return mb, W, logit


def cacopn_reference(q, W):
    """Pure-JAX reference for correctness checking (mirrors F.normalize dim=0)."""
    norm = jnp.sqrt(jnp.sum(W * W, axis=0, keepdims=True))
    mb = W / jnp.maximum(norm, 1e-12)
    logit = jnp.einsum("nc,ck->nk", q, mb)
    return mb, W, logit


if __name__ == "__main__":
    # Small deterministic shapes: bank_size=128, dim=32, batch of queries N=8.
    bank_size = 128
    dim = 32
    n_queries = 8

    key = jax.random.PRNGKey(0)
    k_w, k_q = jax.random.split(key)

    # Deterministic init (mirrors torch.randn for buffer W; buffer v is only
    # used in .update(), which plays no role in forward).
    W = jax.random.normal(k_w, (dim, bank_size), dtype=jnp.float32)
    q = jax.random.normal(k_q, (n_queries, dim), dtype=jnp.float32)

    mb, w_out, logit = cacopn_forward(q, W)
    jax.block_until_ready((mb, w_out, logit))

    # Validate against the pure-JAX reference. With precision=HIGHEST the
    # post-scaled matmul differs only by ~1 ulp rounding from normalizing
    # before the matmul.
    mb_ref, w_ref_out, logit_ref = cacopn_reference(q, W)
    assert jnp.allclose(mb, mb_ref, atol=1e-5, rtol=1e-5)
    assert jnp.allclose(w_out, w_ref_out)
    assert jnp.allclose(logit, logit_ref, atol=1e-5, rtol=1e-5)

    print("KERNEL_OK")
</pallas_src>

<mosaic_0001>
module attributes {stable_mosaic.version = 11 : i64} {
  func.func @_cacopn_kernel(%arg0: i32, %arg1: memref<8x32xf32, #tpu.memory_space<vmem>>, %arg2: memref<32x128xf32, #tpu.memory_space<vmem>>, %arg3: memref<32x128xf32, #tpu.memory_space<vmem>>, %arg4: memref<8x128xf32, #tpu.memory_space<vmem>>) attributes {dimension_semantics = [#tpu.dimension_semantics<parallel>], iteration_bounds = array<i64: 1>, scalar_prefetch = 0 : i64, scratch_operands = 0 : i64, tpu.core_type = #tpu.core_type<tc>, window_params = [{pipeline_mode = #tpu.pipeline_mode<synchronous>, transform_indices = @transform_0, window_bounds = array<i64: 8, 32>}, {transform_indices = @transform_1, window_bounds = array<i64: 32, 128>}, {transform_indices = @transform_2, window_bounds = array<i64: 32, 128>}, {transform_indices = @transform_3, window_bounds = array<i64: 8, 128>}]} {
    %c0 = arith.constant 0 : index
    %c0_0 = arith.constant 0 : index
    %0 = vector.load %arg2[%c0, %c0_0] : memref<32x128xf32, #tpu.memory_space<vmem>>, vector<32x128xf32>
    %c0_1 = arith.constant 0 : index
    %c0_2 = arith.constant 0 : index
    %1 = vector.load %arg1[%c0_1, %c0_2] : memref<8x32xf32, #tpu.memory_space<vmem>>, vector<8x32xf32>
    %2 = arith.mulf %0, %0 : vector<32x128xf32>
    %cst = arith.constant dense<0.000000e+00> : vector<128xf32>
    %3 = vector.multi_reduction <add>, %2, %cst [0] : vector<32x128xf32> to vector<128xf32>
    %4 = vector.shape_cast %3 : vector<128xf32> to vector<1x128xf32>
    %cst_3 = arith.constant 1.000000e-24 : f32
    %5 = vector.broadcast %cst_3 : f32 to vector<1x128xf32>
    %6 = arith.maximumf %4, %5 : vector<1x128xf32>
    %7 = math.rsqrt %6 : vector<1x128xf32>
    %cst_4 = arith.constant dense<0.000000e+00> : vector<8x128xf32>
    %8 = tpu.matmul %1, %0, %cst_4 {dimension_numbers = #tpu.dot_dimension_numbers<[1], [0], [0], [1], [0, 0, 1, 1], [], []>, precision = #tpu.contract_precision<fp32>} : vector<8x32xf32>, vector<32x128xf32>, vector<8x128xf32> -> vector<8x128xf32>
    %9 = vector.broadcast %7 : vector<1x128xf32> to vector<8x128xf32>
    %10 = arith.mulf %8, %9 : vector<8x128xf32>
    %c0_5 = arith.constant 0 : index
    %c0_6 = arith.constant 0 : index
    %11 = vector.load %arg4[%c0_5, %c0_6] : memref<8x128xf32, #tpu.memory_space<vmem>>, vector<8x128xf32>
    tpu.vector_store %arg4[%c0_5, %c0_6], %10 {strides = array<i32>} : memref<8x128xf32, #tpu.memory_space<vmem>>, vector<8x128xf32>,
    %12 = vector.broadcast %7 : vector<1x128xf32> to vector<32x128xf32>
    %13 = arith.mulf %0, %12 : vector<32x128xf32>
    %c0_7 = arith.constant 0 : index
    %c0_8 = arith.constant 0 : index
    %14 = vector.load %arg3[%c0_7, %c0_8] : memref<32x128xf32, #tpu.memory_space<vmem>>, vector<32x128xf32>
    tpu.vector_store %arg3[%c0_7, %c0_8], %13 {strides = array<i32>} : memref<32x128xf32, #tpu.memory_space<vmem>>, vector<32x128xf32>,
    return
  }
  func.func @transform_0(%arg0: i32) -> (i32, i32) {
    %c0_i32 = arith.constant 0 : i32
    %c0_i32_0 = arith.constant 0 : i32
    %c0_i32_1 = arith.constant 0 : i32
    return %c0_i32, %c0_i32_0 : i32, i32
  }
  func.func @transform_1(%arg0: i32) -> (i32, i32) {
    %c0_i32 = arith.constant 0 : i32
    %c0_i32_0 = arith.constant 0 : i32
    return %c0_i32, %arg0 : i32, i32
  }
  func.func @transform_2(%arg0: i32) -> (i32, i32) {
    %c0_i32 = arith.constant 0 : i32
    %c0_i32_0 = arith.constant 0 : i32
    return %c0_i32, %arg0 : i32, i32
  }
  func.func @transform_3(%arg0: i32) -> (i32, i32) {
    %c0_i32 = arith.constant 0 : i32
    %c0_i32_0 = arith.constant 0 : i32
    return %c0_i32, %arg0 : i32, i32
  }
}

</mosaic_0001>

<bundles_post_ra>
// kernel: _cacopn_pallas.1
= control target key start
LH: loop header
LB: loop body
LE: loop exit
PB: predicated region body
PF: predicated region fallthrough
CT: control target
= control target key end

     0   :  { %9 = vsyncpa [#allocation3], 0  ;;  %s493_s0 = inlined_call_operand.hbm [shape: f32[8,32], index: 0, kind: input, shape index: {}]   ;;  %s494_s1 = inlined_call_operand.hbm [shape: f32[32,128], index: 1, kind: input, shape index: {}]   ;;  %s495_s2 = inlined_call_operand.hbm [shape: f32[32,128], index: 2, kind: output, shape index: {0}]   ;;  %s496_s3 = inlined_call_operand.hbm [shape: f32[8,128], index: 3, kind: output, shape index: {1}]  }
   0x1   :  { %10 = vsyncpa [#allocation6], 0 }
   0x2   :  { %11 = vsyncpa [#allocation4], 0 }
   0x3   :  { %12 = vsyncpa [#allocation9], 0  ;;  %s18_s14 = sshll.u32 %s493_s0, 4  ;;  %s421_s15 = smov [#allocation2]   ;;  %s19_s14 = int_to_ptr.hbm [resolvable:$true] %s18_s14 }
   0x4   :  { %s20_s16 = sshll.u32 %s421_s15, 4  ;;  %s28_s19 = sshll.u32 %s494_s1, 4  ;;  %s21_s16 = int_to_ptr.vmem [resolvable:$true] %s20_s16  ;;  %s29_s19 = int_to_ptr.hbm [resolvable:$true] %s28_s19 }
   0x5   :  { %23 = dma.hbm_to_vmem [thread:$0]  %s19_s14, 128, %s21_s16, [#allocation3]  }
   0x6   :  { %s422_s20 = smov [#allocation5]   ;;  %s423_s22 = smov 128  }
   0x7   :  { %s30_s21 = sshll.u32 %s422_s20, 4  ;;  %s424_s23 = smov 8   ;;  %s31_s21 = int_to_ptr.vmem [resolvable:$true] %s30_s21 }
   0x8   :  { %36 = dma.hbm_to_vmem [thread:$0]  %s29_s19, 512, %s31_s21, [#allocation6], %s423_s22, %s423_s22, %s424_s23  }
   0x9   :  { %413 = dma.done.wait [#allocation3], 128  }
   0xa   :  { %414 = vsyncadd [#allocation3], 4294967168 }
   0xb   :  { %415 = dma.done.wait [#allocation6], 512  }
   0xc   :  { %416 = vsyncadd [#allocation6], 4294966784  ;;  %v456_v0 = vld [vmem:[#allocation5 + $0x18] sm:$0xff]  ;;  %v458_v1 = vld [vmem:[#allocation5 + $0x10] sm:$0xff]  ;;  %vm74_vm0 = vcmask 261120   ;;  %s425_s0 = smov [#allocation7]  }
   0xd   :  { %v460_v2 = vld [vmem:[#allocation5 + $0x8] sm:$0xff]  ;;  %v90_v3 = vand.u32 4294901760, %v456_v0  ;;  %v92_v4 = vand.u32 4294901760, %v458_v1  ;;  %v464_v5 = vld [vmem:[#allocation5] sm:$0xff]  ;;  %v49_v6 = vld [vmem:[#allocation2] sm:$0xff]  ;;  %v52_v33 = vmul.f32 %v458_v1, %v458_v1  ;;  %v53_v35 = vmul.f32 %v456_v0, %v456_v0  ;;  %s277_s1 = sshll.u32 %s425_s0, 4  ;;  %s278_s1 = int_to_ptr.vmem [resolvable:$true] %s277_s1 }
   0xe   :  { %v94_v7 = vand.u32 4294901760, %v460_v2  ;;  %v96_v8 = vand.u32 4294901760, %v464_v5  ;;  %v76_v11 = vsel %vm74_vm0, %v49_v6, 0  ;;  %v51_v31 = vmul.f32 %v460_v2, %v460_v2  ;;  %s279_s26 = sshll.u32 %s495_s2, 4  ;;  %s426_s2 = smov [#allocation8]   ;;  %s280_s26 = int_to_ptr.hbm [resolvable:$true] %s279_s26 }
   0xf   :  { %v120_v9 = vsub.f32 %v456_v0, %v90_v3  ;;  %91 = vmatpush.msra.mxu0 %v90_v3  ;;  %v126_v10 = vsub.f32 %v458_v1, %v92_v4  ;;  %191 = vmatpush.msra.mxu3 %v90_v3  ;;  %v98_v14 = vand.u32 4294901760, %v76_v11  ;;  %v50_v32 = vmul.f32 %v464_v5, %v464_v5  ;;  %s291_s27 = sshll.u32 %s426_s2, 4  ;;  %s293_s30 = sshll.u32 %s496_s3, 4  ;;  %s292_s27 = int_to_ptr.vmem [resolvable:$true] %s291_s27  ;;  %s294_s30 = int_to_ptr.hbm [resolvable:$true] %s293_s30 }
  0x10   :  { %v132_v12 = vsub.f32 %v460_v2, %v94_v7  ;;  %v138_v13 = vsub.f32 %v464_v5, %v96_v8 }
  0x11   :  { %162 = vmatpush.msra.mxu2 %v120_v9  ;;  %93 = vmatpush.msra.mxu0 %v92_v4  ;;  %v121_v15 = vand.u32 4294901760, %v120_v9  ;;  %v127_v16 = vand.u32 4294901760, %v126_v10  ;;  %v99_v17 = vsub.f32 %v76_v11, %v98_v14  ;;  %v54_v34 = vadd.f32 %v51_v31, %v50_v32 }
  0x12   :  { %193 = vmatpush.msra.mxu3 %v92_v4  ;;  %v133_v18 = vand.u32 4294901760, %v132_v12  ;;  %v139_v19 = vand.u32 4294901760, %v138_v13 }
  0x13   :  { %165 = vmatpush.msra.mxu2 %v126_v10  ;;  %v122_v20 = vsub.f32 %v120_v9, %v121_v15  ;;  %95 = vmatpush.msra.mxu0 %v94_v7  ;;  %v128_v21 = vsub.f32 %v126_v10, %v127_v16  ;;  %v100_v23 = vand.u32 4294901760, %v99_v17  ;;  %v55_v36 = vadd.f32 %v54_v34, %v52_v33 }
  0x14   :  { %195 = vmatpush.msra.mxu3 %v94_v7  ;;  %v134_v22 = vsub.f32 %v132_v12, %v133_v18  ;;  %v140_v26 = vsub.f32 %v138_v13, %v139_v19 }
  0x15   :  { %v123_v24 = vand.u32 4294901760, %v122_v20  ;;  %168 = vmatpush.msra.mxu2 %v132_v12  ;;  %v129_v25 = vand.u32 4294901760, %v128_v21  ;;  %97 = vmatpush.msra.mxu0 %v96_v8  ;;  %v101_v27 = vsub.f32 %v99_v17, %v100_v23  ;;  %v56_v37 = vadd.f32 %v55_v36, %v53_v35 }
  0x16   :  { %197 = vmatpush.msra.mxu3 %v96_v8  ;;  %v135_v28 = vand.u32 4294901760, %v134_v22  ;;  %v141_v30 = vand.u32 4294901760, %v140_v26 }
  0x17   :  { %220 = vmatpush.msrb.mxu0 %v121_v15  ;;  %124 = vmatpush.msra.mxu1 %v123_v24  ;;  %v102_v29 = vand.u32 4294901760, %v101_v27  ;;  %v57_v38 = vrot.slane %v56_v37, 4 }
  0x18   :  { %171 = vmatpush.msra.mxu2 %v138_v13  ;;  %201 = vmatmul.f32.vlgmr.msra.gmra.mxu3 %v100_v23 }
  0x19   :  { %174 = vmatmul.f32.vlgmr.msra.gmra.mxu2 %v99_v17  ;;  %130 = vmatpush.msra.mxu1 %v129_v25  ;;  %v58_v39 = vadd.f32 %v57_v38, %v56_v37 }
  0x1a   :  { %224 = vmatpush.msrb.mxu0 %v127_v16 }
  0x1b   :  { %103 = vmatmul.f32.vlgmr.msra.gmra.mxu0 %v102_v29  ;;  %136 = vmatpush.msra.mxu1 %v135_v28  ;;  %v59_v40 = vrot.slane %v58_v39, 2 }
  0x1c   :  { %228 = vmatpush.msrb.mxu0 %v133_v18 }
  0x1d   :  { %142 = vmatpush.msra.mxu1 %v141_v30  ;;  %v60_v41 = vadd.f32 %v59_v40, %v58_v39 }
  0x1e   :  { %232 = vmatpush.msrb.mxu0 %v139_v19  ;;  %144 = vmatmul.f32.vlgmr.msra.gmra.mxu1 %v98_v14 }
  0x1f   :  { %251 = vmatpush.msrb.mxu1 %v90_v3  ;;  %v61_v42 = vrot.slane %v60_v41, 1 }
  0x21   :  { %253 = vmatpush.msrb.mxu1 %v92_v4  ;;  %v62_v43 = vadd.f32 %v61_v42, %v60_v41 }
  0x23   :  { %234 = vmatmul.f32.vlgmr.msrb.gmra.mxu0 %v98_v14  ;;  %255 = vmatpush.msrb.mxu1 %v94_v7  ;;  %v63_v44 = vmax.f32 %v62_v43, 1e-24 }
  0x25   :  { %257 = vmatpush.msrb.mxu1 %v96_v8  ;;  %315 = vrsqrt.f32 %v63_v44  ;;  %vm70_vm1 = vweird.f32 %v63_v44 }
  0x26   :  { %259 = vmatmul.f32.vlgmr.msrb.gmra.mxu1 %v98_v14 }
  0x2b   :  { %v316_v45 = vpop.eup %315 }
  0x2c   :  { %v65_v46 = vmul.f32 %v316_v45, %v63_v44  ;;  %vm71_vm2 = vweird.f32 %v316_v45 }
  0x2d   :  { %vm72_vm3 = vmor %vm70_vm1, %vm71_vm2 }
  0x2e   :  { %v66_v47 = vmul.f32 %v316_v45, %v65_v46 }
  0x30   :  { %v67_v48 = vmul.f32 0.5, %v66_v47 }
  0x32   :  { %v68_v49 = vsub.f32 1.5, %v67_v48 }
  0x34   :  { %v69_v50 = vmul.f32 %v316_v45, %v68_v49 }
  0x36   :  { %v73_v51 = vsel %vm72_vm3, %v316_v45, %v69_v50 }
  0x37   :  { %v265_v52 = vmul.f32 %v73_v51, %v464_v5  ;;  %v266_v53 = vmul.f32 %v73_v51, %v460_v2  ;;  %v267_v54 = vmul.f32 %v73_v51, %v458_v1  ;;  %v268_v55 = vmul.f32 %v73_v51, %v456_v0 }
  0x39   :  { %269 = vst [vmem:[#allocation7] sm:$0xff] %v265_v52 }
  0x3a   :  { %270 = vst [vmem:[#allocation7 + $0x8] sm:$0xff] %v266_v53 }
  0x3b   :  { %271 = vst [vmem:[#allocation7 + $0x10] sm:$0xff] %v267_v54 }
  0x3c   :  { %272 = vst [vmem:[#allocation7 + $0x18] sm:$0xff] %v268_v55 }
  0x3d   :  { %285 = dma.vmem_to_hbm [thread:$0]  %s278_s1, 512, %s280_s26, [#allocation4], %s423_s22, %s423_s22, %s424_s23  }
  0x98   :  { %v104_v56 = vpop.f32.mrf.mxu0 }
  0x9b   :  { %v145_v57 = vpop.f32.mrf.mxu1  ;;  %v202_v60 = vpop.f32.mrf.mxu3 }
  0x9c   :  { %v175_v58 = vpop.f32.mrf.mxu2  ;;  %v146_v59 = vadd.f32 %v145_v57, %v104_v56 }
  0x9e   :  { %v176_v61 = vadd.f32 %v175_v58, %v146_v59 }
  0xa0   :  { %v235_v62 = vpop.f32.mrf.mxu0  ;;  %v203_v63 = vadd.f32 %v202_v60, %v176_v61 }
  0xa2   :  { %v236_v1 = vadd.f32 %v235_v62, %v203_v63 }
  0xa3   :  { %v260_v0 = vpop.f32.mrf.mxu1 }
  0xa4   :  { %v261_v2 = vadd.f32 %v260_v0, %v236_v1 }
  0xa6   :  { %v263_v3 = vmul.f32 %v261_v2, %v73_v51 }
  0xa8   :  { %264 = vst [vmem:[#allocation8] sm:$0xff] %v263_v3 }
  0xa9   :  { %296 = dma.vmem_to_hbm [thread:$0]  %s292_s27, 128, %s294_s30, [#allocation9]  }
  0xaa   :  { %417 = dma.done.wait [#allocation4], 512  }
  0xab   :  { %418 = vsyncadd [#allocation4], 4294966784 }
  0xac   :  { %419 = dma.done.wait [#allocation9], 128  }
  0xad   :  { %420 = vsyncadd [#allocation9], 4294967168 }
  0xae   :  { %305 = vsyncpa [#allocation3], 1 }
  0xaf   :  { %306 = vsyncpa [#allocation6], 1 }
  0xb0   :  { %307 = vsyncpa [#allocation4], 1 }
  0xb1   :  { %308 = vsyncpa [#allocation9], 1 }

</bundles_post_ra>
